<compile_context>
chip_gen: v5e
topology: v5e:2x2
jax: 0.10.0
libtpu: 0.0.40
codegen_flags: <defaults>
</compile_context>

<pallas_src>
import jax
import jax.numpy as jnp
from jax.experimental import pallas as pl
from jax.experimental.pallas import tpu as pltpu


def net_kernel(x_ref, w1_ref, b1_ref, w5_ref, b5_ref, o_ref):
    """One batch tile: 3 MXU matmuls (bf16 operands, f32 acc) + relu + log_softmax."""
    x = x_ref[...].astype(jnp.bfloat16)              # (TB, D)  f32 -> bf16 in-kernel
    w1 = w1_ref[...]                                 # (D, H)   bf16, VMEM-resident
    b1 = b1_ref[...]                                 # (1, H)   f32
    w5 = w5_ref[...]                                 # (H, H)   bf16, VMEM-resident
    b5 = b5_ref[...]                                 # (1, H)   f32

    # fc1 + relu
    h = jnp.dot(x, w1, preferred_element_type=jnp.float32) + b1
    h = jnp.maximum(h, 0.0)
    # fc5 + relu
    h = jnp.dot(h.astype(jnp.bfloat16), w5, preferred_element_type=jnp.float32) + b5
    h = jnp.maximum(h, 0.0)
    # fc5 again (no relu) — mirrors the PyTorch forward reusing fc5; fc6 unused.
    z = jnp.dot(h.astype(jnp.bfloat16), w5, preferred_element_type=jnp.float32) + b5

    # log_softmax over last dim (numerically stable, f32)
    m = jnp.max(z, axis=-1, keepdims=True)
    s = z - m
    lse = jnp.log(jnp.sum(jnp.exp(s), axis=-1, keepdims=True))
    o_ref[...] = (s - lse).astype(o_ref.dtype)


def _round_up(n, m):
    return ((n + m - 1) // m) * m


def net_forward(x, w1, b1, w5, b5, *, tile_b=8192, out_dtype=jnp.float32):
    B, D = x.shape
    H = w1.shape[1]  # 128

    # Only the (tiny) weights are cast to bf16 wrapper-side; x stays f32 and is
    # cast inside the kernel (avoids a standalone HBM convert pass over x).
    w1_bf = w1.astype(jnp.bfloat16)
    w5_bf = w5.astype(jnp.bfloat16)

    # Batch tile selection:
    #   * tiny batch (B <= 16): one block equal to the full batch extent
    #     (tiling-legal, no padding needed).
    #   * otherwise: multiple of 16, capped so the grid has >= 2 steps
    #     (keeps both v7x TensorCores busy) and by tile_b.
    # No padding / slicing: the ragged last block is masked on write by Pallas.
    if B <= 16:
        tb = B
    else:
        tb = min(tile_b, _round_up(pl.cdiv(B, 2), 16))
    grid = (pl.cdiv(B, tb),)

    out_bytes = jnp.dtype(out_dtype).itemsize
    flops = 2 * B * (D * H + 2 * H * H)
    bytes_accessed = (B * D * 4 + B * H * out_bytes          # x (f32) + out
                      + (D * H + H * H) * 2 + 2 * H * 4)     # weights (bf16) + biases (f32)

    out = pl.pallas_call(
        net_kernel,
        out_shape=jax.ShapeDtypeStruct((B, H), out_dtype),
        grid=grid,
        in_specs=[
            pl.BlockSpec((tb, D), lambda i: (i, 0)),   # x: streamed per batch tile
            pl.BlockSpec((D, H), lambda i: (0, 0)),    # w1: VMEM-resident
            pl.BlockSpec((1, H), lambda i: (0, 0)),    # b1: VMEM-resident
            pl.BlockSpec((H, H), lambda i: (0, 0)),    # w5: VMEM-resident
            pl.BlockSpec((1, H), lambda i: (0, 0)),    # b5: VMEM-resident
        ],
        out_specs=pl.BlockSpec((tb, H), lambda i: (i, 0)),
        compiler_params=pltpu.CompilerParams(
            dimension_semantics=("parallel",),         # v7x: shard batch tiles across 2 TCs
            vmem_limit_bytes=48 * 1024 * 1024),        # headroom for the large tile (<= v7x 64 MiB)
        cost_estimate=pl.CostEstimate(
            flops=flops, transcendentals=B * H, bytes_accessed=bytes_accessed),
    )(x, w1_bf, b1, w5_bf, b5)

    return out


def init_linear(key, fan_in, fan_out):
    """PyTorch nn.Linear default init: U(-1/sqrt(fan_in), 1/sqrt(fan_in)).
    Returns W already transposed to (fan_in, fan_out) plus bias (1, fan_out)."""
    kw, kb = jax.random.split(key)
    bound = 1.0 / jnp.sqrt(fan_in)
    w = jax.random.uniform(kw, (fan_in, fan_out), jnp.float32, -bound, bound)
    b = jax.random.uniform(kb, (1, fan_out), jnp.float32, -bound, bound)
    return w, b


def reference_forward_f32(x, w1, b1, w5, b5):
    h = jax.nn.relu(x @ w1 + b1)
    h = jax.nn.relu(h @ w5 + b5)
    z = h @ w5 + b5
    return jax.nn.log_softmax(z, axis=-1)


def reference_forward_bf16(x, w1, b1, w5, b5):
    """Reference with the same bf16-operand / f32-accumulate matmul discipline."""
    dot = lambda a, b: jnp.dot(a.astype(jnp.bfloat16), b.astype(jnp.bfloat16),
                               preferred_element_type=jnp.float32)
    h = jax.nn.relu(dot(x, w1) + b1)
    h = jax.nn.relu(dot(h, w5) + b5)
    z = dot(h, w5) + b5
    return jax.nn.log_softmax(z, axis=-1)


if __name__ == "__main__":
    D, H = 32, 128  # D stands in for train_X.shape[1]

    key = jax.random.PRNGKey(0)
    kx, k1, k5, k6 = jax.random.split(key, 4)

    w1, b1 = init_linear(k1, D, H)     # fc1
    w5, b5 = init_linear(k5, H, H)     # fc5 (used twice in forward)
    w6, b6 = init_linear(k6, H, 11)    # fc6 — declared in __init__ but never used in forward

    # Small case (B=2): single full-extent block, no padding.
    x_small = jax.random.normal(kx, (2, D), jnp.float32)
    out_small = jax.block_until_ready(net_forward(x_small, w1, b1, w5, b5))
    assert out_small.shape == (2, H)
    ref_bf = reference_forward_bf16(x_small, w1, b1, w5, b5)
    ref_f32 = reference_forward_f32(x_small, w1, b1, w5, b5)
    assert jnp.allclose(out_small, ref_bf, atol=1e-2, rtol=1e-2), "mismatch vs bf16 reference"
    assert jnp.allclose(out_small, ref_f32, atol=5e-2, rtol=5e-2), "mismatch vs f32 reference"

    # Larger, non-multiple-of-tile batch: exercises the multi-tile pipelined path
    # with a ragged (masked) last block and the >=2-step grid cap.
    x_big = jax.random.normal(kx, (1000, D), jnp.float32)
    out_big = jax.block_until_ready(net_forward(x_big, w1, b1, w5, b5))
    assert out_big.shape == (1000, H)
    ref_big = reference_forward_bf16(x_big, w1, b1, w5, b5)
    assert jnp.allclose(out_big, ref_big, atol=1e-2, rtol=1e-2), "mismatch vs bf16 reference (big)"
    assert bool(jnp.all(jnp.isfinite(out_big))), "non-finite values in visible output rows"

    print("KERNEL_OK")
</pallas_src>

<mosaic_0001>
module attributes {stable_mosaic.version = 11 : i64} {
  func.func @net_kernel(%arg0: i32, %arg1: memref<2x32xf32, #tpu.memory_space<vmem>>, %arg2: memref<32x128xbf16, #tpu.memory_space<vmem>>, %arg3: memref<1x128xf32, #tpu.memory_space<vmem>>, %arg4: memref<128x128xbf16, #tpu.memory_space<vmem>>, %arg5: memref<1x128xf32, #tpu.memory_space<vmem>>, %arg6: memref<2x128xf32, #tpu.memory_space<vmem>>) attributes {dimension_semantics = [#tpu.dimension_semantics<parallel>], iteration_bounds = array<i64: 1>, scalar_prefetch = 0 : i64, scratch_operands = 0 : i64, tpu.core_type = #tpu.core_type<tc>, window_params = [{transform_indices = @transform_0, window_bounds = array<i64: 2, 32>}, {pipeline_mode = #tpu.pipeline_mode<synchronous>, transform_indices = @transform_1, window_bounds = array<i64: 32, 128>}, {pipeline_mode = #tpu.pipeline_mode<synchronous>, transform_indices = @transform_2, window_bounds = array<i64: 1, 128>}, {pipeline_mode = #tpu.pipeline_mode<synchronous>, transform_indices = @transform_3, window_bounds = array<i64: 128, 128>}, {pipeline_mode = #tpu.pipeline_mode<synchronous>, transform_indices = @transform_4, window_bounds = array<i64: 1, 128>}, {transform_indices = @transform_5, window_bounds = array<i64: 2, 128>}]} {
    %c0 = arith.constant 0 : index
    %c0_0 = arith.constant 0 : index
    %0 = vector.load %arg1[%c0, %c0_0] : memref<2x32xf32, #tpu.memory_space<vmem>>, vector<2x32xf32>
    %1 = arith.truncf %0 : vector<2x32xf32> to vector<2x32xbf16>
    %c0_1 = arith.constant 0 : index
    %c0_2 = arith.constant 0 : index
    %2 = vector.load %arg2[%c0_1, %c0_2] : memref<32x128xbf16, #tpu.memory_space<vmem>>, vector<32x128xbf16>
    %c0_3 = arith.constant 0 : index
    %c0_4 = arith.constant 0 : index
    %3 = vector.load %arg3[%c0_3, %c0_4] : memref<1x128xf32, #tpu.memory_space<vmem>>, vector<1x128xf32>
    %c0_5 = arith.constant 0 : index
    %c0_6 = arith.constant 0 : index
    %4 = vector.load %arg4[%c0_5, %c0_6] : memref<128x128xbf16, #tpu.memory_space<vmem>>, vector<128x128xbf16>
    %c0_7 = arith.constant 0 : index
    %c0_8 = arith.constant 0 : index
    %5 = vector.load %arg5[%c0_7, %c0_8] : memref<1x128xf32, #tpu.memory_space<vmem>>, vector<1x128xf32>
    %cst = arith.constant dense<0.000000e+00> : vector<2x128xf32>
    %6 = tpu.matmul %1, %2, %cst {dimension_numbers = #tpu.dot_dimension_numbers<[1], [0], [0], [1], [0, 0, 1, 1], [], []>} : vector<2x32xbf16>, vector<32x128xbf16>, vector<2x128xf32> -> vector<2x128xf32>
    %7 = vector.broadcast %3 : vector<1x128xf32> to vector<2x128xf32>
    %8 = arith.addf %6, %7 : vector<2x128xf32>
    %cst_9 = arith.constant 0.000000e+00 : f32
    %9 = vector.broadcast %cst_9 : f32 to vector<2x128xf32>
    %10 = arith.maximumf %8, %9 : vector<2x128xf32>
    %11 = arith.truncf %10 : vector<2x128xf32> to vector<2x128xbf16>
    %cst_10 = arith.constant dense<0.000000e+00> : vector<2x128xf32>
    %12 = tpu.matmul %11, %4, %cst_10 {dimension_numbers = #tpu.dot_dimension_numbers<[1], [0], [0], [1], [0, 0, 1, 1], [], []>} : vector<2x128xbf16>, vector<128x128xbf16>, vector<2x128xf32> -> vector<2x128xf32>
    %13 = vector.broadcast %5 : vector<1x128xf32> to vector<2x128xf32>
    %14 = arith.addf %12, %13 : vector<2x128xf32>
    %cst_11 = arith.constant 0.000000e+00 : f32
    %15 = vector.broadcast %cst_11 : f32 to vector<2x128xf32>
    %16 = arith.maximumf %14, %15 : vector<2x128xf32>
    %17 = arith.truncf %16 : vector<2x128xf32> to vector<2x128xbf16>
    %cst_12 = arith.constant dense<0.000000e+00> : vector<2x128xf32>
    %18 = tpu.matmul %17, %4, %cst_12 {dimension_numbers = #tpu.dot_dimension_numbers<[1], [0], [0], [1], [0, 0, 1, 1], [], []>} : vector<2x128xbf16>, vector<128x128xbf16>, vector<2x128xf32> -> vector<2x128xf32>
    %19 = vector.broadcast %5 : vector<1x128xf32> to vector<2x128xf32>
    %20 = arith.addf %18, %19 : vector<2x128xf32>
    %cst_13 = arith.constant dense<0xFF800000> : vector<2xf32>
    %21 = vector.multi_reduction <maximumf>, %20, %cst_13 [1] : vector<2x128xf32> to vector<2xf32>
    %22 = vector.shape_cast %21 : vector<2xf32> to vector<2x1xf32>
    %23 = vector.broadcast %22 : vector<2x1xf32> to vector<2x128xf32>
    %24 = arith.subf %20, %23 : vector<2x128xf32>
    %25 = math.exp %24 : vector<2x128xf32>
    %cst_14 = arith.constant dense<0.000000e+00> : vector<2xf32>
    %26 = vector.multi_reduction <add>, %25, %cst_14 [1] : vector<2x128xf32> to vector<2xf32>
    %27 = vector.shape_cast %26 : vector<2xf32> to vector<2x1xf32>
    %28 = math.log %27 : vector<2x1xf32>
    %29 = vector.broadcast %28 : vector<2x1xf32> to vector<2x128xf32>
    %30 = arith.subf %24, %29 : vector<2x128xf32>
    %c0_15 = arith.constant 0 : index
    %c0_16 = arith.constant 0 : index
    %31 = vector.load %arg6[%c0_15, %c0_16] : memref<2x128xf32, #tpu.memory_space<vmem>>, vector<2x128xf32>
    tpu.vector_store %arg6[%c0_15, %c0_16], %30 {strides = array<i32>} : memref<2x128xf32, #tpu.memory_space<vmem>>, vector<2x128xf32>,
    return
  }
  func.func @transform_0(%arg0: i32) -> (i32, i32) {
    %c0_i32 = arith.constant 0 : i32
    %c0_i32_0 = arith.constant 0 : i32
    return %arg0, %c0_i32 : i32, i32
  }
  func.func @transform_1(%arg0: i32) -> (i32, i32) {
    %c0_i32 = arith.constant 0 : i32
    %c0_i32_0 = arith.constant 0 : i32
    %c0_i32_1 = arith.constant 0 : i32
    return %c0_i32, %c0_i32_0 : i32, i32
  }
  func.func @transform_2(%arg0: i32) -> (i32, i32) {
    %c0_i32 = arith.constant 0 : i32
    %c0_i32_0 = arith.constant 0 : i32
    %c0_i32_1 = arith.constant 0 : i32
    return %c0_i32, %c0_i32_0 : i32, i32
  }
  func.func @transform_3(%arg0: i32) -> (i32, i32) {
    %c0_i32 = arith.constant 0 : i32
    %c0_i32_0 = arith.constant 0 : i32
    %c0_i32_1 = arith.constant 0 : i32
    return %c0_i32, %c0_i32_0 : i32, i32
  }
  func.func @transform_4(%arg0: i32) -> (i32, i32) {
    %c0_i32 = arith.constant 0 : i32
    %c0_i32_0 = arith.constant 0 : i32
    %c0_i32_1 = arith.constant 0 : i32
    return %c0_i32, %c0_i32_0 : i32, i32
  }
  func.func @transform_5(%arg0: i32) -> (i32, i32) {
    %c0_i32 = arith.constant 0 : i32
    %c0_i32_0 = arith.constant 0 : i32
    return %arg0, %c0_i32 : i32, i32
  }
}

</mosaic_0001>

<bundles_post_ra>
// kernel: tpu_custom_call.1
= control target key start
LH: loop header
LB: loop body
LE: loop exit
PB: predicated region body
PF: predicated region fallthrough
CT: control target
= control target key end

     0   :  { %10 = vsyncpa [#allocation3], 0  ;;  %s455_s0 = inlined_call_operand.hbm [shape: f32[2,32], index: 0, kind: input, shape index: {}]   ;;  %s456_s1 = inlined_call_operand.hbm [shape: bf16[32,128], index: 1, kind: input, shape index: {}]   ;;  %s457_s2 = inlined_call_operand.vmem [shape: f32[1,128], index: 2, kind: input, shape index: {}]   ;;  %s458_s3 = inlined_call_operand.hbm [shape: bf16[128,128], index: 3, kind: input, shape index: {}]   ;;  %s459_s4 = inlined_call_operand.vmem [shape: f32[1,128], index: 4, kind: input, shape index: {}]   ;;  %s460_s5 = inlined_call_operand.hbm [shape: f32[2,128], index: 5, kind: output, shape index: {}]  }
   0x1   :  { %11 = vsyncpa [#allocation6], 0  ;;  %s28_s20 = sshll.u32 %s456_s1, 4  ;;  %s29_s20 = int_to_ptr.hbm [resolvable:$true] %s28_s20 }
   0x2   :  { %12 = vsyncpa [#allocation4], 0  ;;  %s401_s21 = smov [#allocation5]   ;;  %s18_s25 = sshll.u32 %s455_s0, 4  ;;  %s19_s25 = int_to_ptr.hbm [resolvable:$true] %s18_s25 }
   0x3   :  { %s30_s22 = sshll.u32 %s401_s21, 4  ;;  %s402_s26 = smov 64   ;;  %s31_s22 = int_to_ptr.vmem [resolvable:$true] %s30_s22 }
   0x4   :  { %s403_s27 = smov 4   ;;  %s404_s28 = smov [#allocation2]  }
   0x5   :  { %36 = dma.hbm_to_vmem [thread:$0]  %s29_s20, 256, %s31_s22, [#allocation6], %s402_s26, %s402_s26, %s403_s27  }
   0x6   :  { %s20_s29 = sshll.u32 %s404_s28, 4  ;;  %s43_s7 = sshll.u32 %s458_s3, 4  ;;  %s21_s29 = int_to_ptr.vmem [resolvable:$true] %s20_s29  ;;  %s44_s7 = int_to_ptr.hbm [resolvable:$true] %s43_s7 }
   0x7   :  { %23 = dma.hbm_to_vmem [thread:$0]  %s19_s25, 32, %s21_s29, [#allocation3]  }
   0x8   :  { %s405_s1 = smov [#allocation7]  }
   0x9   :  { %s45_s8 = sshll.u32 %s405_s1, 4  ;;  %s46_s8 = int_to_ptr.vmem [resolvable:$true] %s45_s8 }
   0xa   :  { %51 = dma.hbm_to_vmem [thread:$0]  %s44_s7, 1024, %s46_s8, [#allocation6], %s402_s26, %s402_s26, %s403_s27  }
   0xb   :  { %395 = dma.done.wait [#allocation3], 32  }
   0xc   :  { %396 = vsyncadd [#allocation3], 4294967264 }
   0xd   :  { %397 = dma.done.wait [#allocation6], 1280  }
   0xe   :  { %398 = vsyncadd [#allocation6], 4294966016  ;;  %v278_v0 = vld [vmem:[#allocation5 + $0x8] sm:$0xff]  ;;  %v277_v2 = vld [vmem:[#allocation5] sm:$0xff]  ;;  %vm106_vm0 = vcmask 261120   ;;  %vm204_vm1 = vcmask 1041408  }
   0xf   :  { %v286_v1 = vld [vmem:[#allocation7 + $0x38] sm:$0xff]  ;;  %116 = vmatpush.bf16.msra.mxu0 %v278_v0  ;;  %v67_v3 = vld [vmem:[#allocation2] sm:$0x3]  ;;  %v285_v4 = vld [vmem:[#allocation7 + $0x30] sm:$0xff]  ;;  %s225_s13 = sshll.u32 %s460_s5, 4  ;;  %s226_s13 = int_to_ptr.hbm [resolvable:$true] %s225_s13 }
  0x10   :  { %176 = vmatpush.bf16.msra.mxu1 %v286_v1  ;;  %191 = vmatpush.bf16.msra.mxu2 %v286_v1  ;;  %v68_v5 = vpack.c.bf16 %v67_v3, %v67_v3  ;;  %v284_v6 = vld [vmem:[#allocation7 + $0x28] sm:$0xff]  ;;  %v283_v7 = vld [vmem:[#allocation7 + $0x20] sm:$0xff]  ;;  %v282_v8 = vld [vmem:[#allocation7 + $0x18] sm:$0xff] }
  0x11   :  { %v281_v9 = vld [vmem:[#allocation7 + $0x10] sm:$0xff]  ;;  %v280_v10 = vld [vmem:[#allocation7 + $0x8] sm:$0xff]  ;;  %v279_v11 = vld [vmem:[#allocation7] sm:$0xff] }
  0x12   :  { %v293_v12 = vld [vmem:[%s457_s2] ss:$0 sm:$0xff]  ;;  %s406_s2 = smov [#allocation8]  }
  0x13   :  { %117 = vmatpush.bf16.msra.mxu0 %v277_v2  ;;  %v294_v18 = vld [vmem:[%s459_s4] ss:$0 sm:$0xff]  ;;  %s223_s4 = sshll.u32 %s406_s2, 4  ;;  %s224_s4 = int_to_ptr.vmem [resolvable:$true] %s223_s4 }
  0x14   :  { %177 = vmatpush.bf16.msra.mxu1 %v285_v4  ;;  %192 = vmatpush.bf16.msra.mxu2 %v285_v4 }
  0x16   :  { %244 = vmatmul.msk.bf16.vlgmr.msra.gmra.mxu0 %vm106_vm0, %v68_v5 }
  0x18   :  { %178 = vmatpush.bf16.msra.mxu1 %v284_v6  ;;  %193 = vmatpush.bf16.msra.mxu2 %v284_v6 }
  0x1c   :  { %179 = vmatpush.bf16.msra.mxu1 %v283_v7  ;;  %194 = vmatpush.bf16.msra.mxu2 %v283_v7 }
  0x20   :  { %180 = vmatpush.bf16.msra.mxu1 %v282_v8  ;;  %195 = vmatpush.bf16.msra.mxu2 %v282_v8 }
  0x24   :  { %181 = vmatpush.bf16.msra.mxu1 %v281_v9  ;;  %196 = vmatpush.bf16.msra.mxu2 %v281_v9 }
  0x28   :  { %182 = vmatpush.bf16.msra.mxu1 %v280_v10  ;;  %197 = vmatpush.bf16.msra.mxu2 %v280_v10 }
  0x2c   :  { %183 = vmatpush.bf16.msra.mxu1 %v279_v11  ;;  %198 = vmatpush.bf16.msra.mxu2 %v279_v11 }
  0x93   :  { %v119_v13 = vpop.f32.mrf.mxu0 }
  0x94   :  { %v120_v14 = vadd.f32 %v293_v12, %v119_v13 }
  0x96   :  { %v123_v15 = vmax.f32 %v120_v14, 0.0 }
  0x98   :  { %v124_v16 = vpack.c.bf16 %v123_v15, %v123_v15 }
  0x9a   :  { %184 = vmatmul.bf16.vlgmr.msra.gmra.mxu1 %v124_v16 }
  0x9b   :  { %v121_v17 = vpop.f32.mrf.mxu0 }
 0x117   :  { %v185_v19 = vpop.f32.mrf.mxu1 }
 0x118   :  { %v186_v20 = vadd.f32 %v294_v18, %v185_v19 }
 0x11a   :  { %v189_v21 = vmax.f32 %v186_v20, 0.0 }
 0x11c   :  { %v190_v22 = vpack.c.bf16 %v189_v21, %v189_v21 }
 0x11e   :  { %199 = vmatmul.bf16.vlgmr.msra.gmra.mxu2 %v190_v22 }
 0x11f   :  { %v187_v23 = vpop.f32.mrf.mxu1 }
 0x1a1   :  { %v200_v24 = vpop.f32.mrf.mxu2 }
 0x1a2   :  { %v201_v25 = vadd.f32 %v294_v18, %v200_v24 }
 0x1a4   :  { %v205_v26 = vsel %vm204_vm1, %v201_v25, -inf }
 0x1a5   :  { %206 = vmax.xlane.f32.xlu0 %v205_v26 }
 0x1a9   :  { %v202_v27 = vpop.f32.mrf.mxu2 }
 0x218   :  { %v207_v28 = vpop.xlane.xlu0 %206 }
 0x219   :  { %v208_v29 = vsub.f32 %v201_v25, %v207_v28 }
 0x21b   :  { %v209_v30 = vmul.f32 1.442695, %v208_v29 }
 0x21d   :  { %295 = vpow2.f32 %v209_v30 }
 0x223   :  { %v296_v31 = vpop.eup %295 }
 0x224   :  { %v211_v32 = vsel %vm204_vm1, %v296_v31, 0.0 }
 0x225   :  { %212 = vadd.xlane.f32.xlu0 %v211_v32 }
 0x298   :  { %v213_v33 = vpop.xlane.xlu0 %212 }
 0x299   :  { %297 = vlog2.f32 %v213_v33 }
 0x29f   :  { %v298_v34 = vpop.eup %297 }
 0x2a0   :  { %v215_v35 = vmul.f32 0.6931472, %v298_v34 }
 0x2a2   :  { %v216_v36 = vsub.f32 %v208_v29, %v215_v35 }
 0x2a4   :  { %217 = vst [vmem:[#allocation8] sm:$0x3] %v216_v36 }
 0x2a5   :  { %228 = dma.vmem_to_hbm [thread:$0]  %s224_s4, 32, %s226_s13, [#allocation4]  }
 0x2a6   :  { %399 = dma.done.wait [#allocation4], 32  }
 0x2a7   :  { %400 = vsyncadd [#allocation4], 4294967264 }
 0x2a8   :  { %233 = vsyncpa [#allocation3], 1 }
 0x2a9   :  { %234 = vsyncpa [#allocation6], 1 }
 0x2aa   :  { %235 = vsyncpa [#allocation4], 1 }

</bundles_post_ra>
